<compile_context>
chip_gen: v6e
topology: v6e:2x2x1
jax: 0.10.0
libtpu: 0.0.40
codegen_flags: <defaults>
</compile_context>

<pallas_src>
import functools

import jax
import jax.numpy as jnp
from jax.experimental import pallas as pl
from jax.experimental.pallas import tpu as pltpu


def _make_kernel(fuse_l1):
    def kernel(state_ref, act_ref, w1_ref, w2_ref, w3_ref, w4_ref,
               w5_ref, w6_ref, b_ref, out_ref):
        f32, bf16 = jnp.float32, jnp.bfloat16
        state_f = state_ref[...].astype(f32)      # [T, S]
        act_f = act_ref[...].astype(f32)          # [T, A]
        s_bf = state_f.astype(bf16)

        # ---- LOB encoder: Linear(40,128)+ReLU, Linear(128,64)+ReLU ----
        # w1 is zero-padded over the non-LOB columns of state, so the full
        # state block is a valid LHS (no in-kernel column slice needed).
        h = jnp.dot(s_bf, w1_ref[...], preferred_element_type=f32)
        h = jnp.maximum(h + b_ref[0:1, 0:128], 0.0)
        enc = jnp.dot(h.astype(bf16), w2_ref[...], preferred_element_type=f32)
        enc = jnp.maximum(enc + b_ref[1:2, 0:64], 0.0)        # [T, 64]

        # ---- value-net L1 on concat([lob_enc, other, action]) ----
        n_enc = enc.shape[-1]
        n_s = state_f.shape[-1]
        n_a = act_f.shape[-1]
        if fuse_l1:
            # Single MXU pass over [enc || state || action]; the LOB rows of
            # w3 are zero, so this equals concat([enc, other, action]) @ W3.
            comb = jnp.concatenate([enc, state_f, act_f], axis=-1).astype(bf16)
            c = jnp.dot(comb, w3_ref[...], preferred_element_type=f32)
        else:
            # Fallback (same math, no lane concat): three partial matmuls.
            c = jnp.dot(enc.astype(bf16), w3_ref[0:n_enc, :],
                        preferred_element_type=f32)
            c = c + jnp.dot(s_bf, w3_ref[n_enc:n_enc + n_s, :],
                            preferred_element_type=f32)
            c = c + jnp.dot(act_f.astype(bf16),
                            w3_ref[n_enc + n_s:n_enc + n_s + n_a, :],
                            preferred_element_type=f32)
        c = jnp.maximum(c + b_ref[2:3, 0:256], 0.0)            # [T, 256]

        # ---- value-net L2, L3 ----
        c = jnp.dot(c.astype(bf16), w4_ref[...], preferred_element_type=f32)
        c = jnp.maximum(c + b_ref[3:4, 0:128], 0.0)            # [T, 128]
        c = jnp.dot(c.astype(bf16), w5_ref[...], preferred_element_type=f32)
        c = jnp.maximum(c + b_ref[4:5, 0:64], 0.0)             # [T, 64]

        # ---- final Linear(64,1): VPU multiply + lane reduce (skip N=1 MXU) ----
        q = jnp.sum(c * w6_ref[...], axis=-1, keepdims=True)   # [T, 1]
        out_ref[...] = q + b_ref[5:6, 0:1]

    return kernel


def _xavier_uniform(key, fan_in, fan_out, dtype=jnp.float32):
    bound = (6.0 / (fan_in + fan_out)) ** 0.5
    # Stored as [in, out]; xavier-uniform is symmetric so this matches the
    # distribution of PyTorch's [out, in] init.
    return jax.random.uniform(key, (fan_in, fan_out), dtype, -bound, bound)


def init_params(key, state_dim, action_dim, lob_depth=10):
    lob_dim = lob_depth * 4
    other_dim = state_dim - lob_dim
    dims = [
        (lob_dim, 128),                       # lob_encoder L1
        (128, 64),                            # lob_encoder L2
        (64 + other_dim + action_dim, 256),   # value L1
        (256, 128),                           # value L2
        (128, 64),                            # value L3
        (64, 1),                              # value L4
    ]
    keys = jax.random.split(key, len(dims))
    params = {}
    for i, ((fi, fo), k) in enumerate(zip(dims, keys), start=1):
        params[f"w{i}"] = _xavier_uniform(k, fi, fo)
        params[f"b{i}"] = jnp.zeros((1, fo), jnp.float32)      # constant_(bias, 0)
    return params


def _pick_tile(batch, tile_b):
    # Multiple of 16 (bf16 sublane packing), capped for v7x's 64 MiB VMEM.
    tb = max(16, (min(int(tile_b), 4096) // 16) * 16)
    if batch <= tb:
        if batch >= 256:
            # >= 2 grid steps so ("parallel",) can shard across v7x's 2 TCs.
            half = (batch + 1) // 2
            tb = ((half + 15) // 16) * 16
        else:
            tb = batch     # single full-extent block (always legal)
    return tb


@functools.partial(jax.jit, static_argnames=("lob_depth", "tile_b", "fuse_l1"))
def market_making_critic(state, action, params, lob_depth=10, tile_b=2048,
                         fuse_l1=True):
    """state: [B, state_dim], action: [B, action_dim] -> Q: [B, 1] f32."""
    B, state_dim = state.shape
    act_dim = action.shape[1]
    lob_dim = lob_depth * 4
    other_dim = state_dim - lob_dim
    f32, bf16 = jnp.float32, jnp.bfloat16

    tb = _pick_tile(B, tile_b)
    grid = (pl.cdiv(B, tb),)

    # ---- fold the state column split into zero-padded weights (tiny) ----
    w1_pad = jnp.zeros((state_dim, 128), f32).at[:lob_dim, :].set(
        params["w1"]).astype(bf16)
    k3 = 64 + state_dim + act_dim
    w3 = params["w3"]
    w3_full = jnp.zeros((k3, 256), f32)
    w3_full = w3_full.at[:64, :].set(w3[:64])                              # enc
    w3_full = w3_full.at[64 + lob_dim:64 + state_dim, :].set(
        w3[64:64 + other_dim])                                             # other
    w3_full = w3_full.at[64 + state_dim:, :].set(w3[64 + other_dim:])      # action
    w3_full = w3_full.astype(bf16)
    w2b = params["w2"].astype(bf16)
    w4b = params["w4"].astype(bf16)
    w5b = params["w5"].astype(bf16)
    w6_row = params["w6"].reshape(1, 64).astype(f32)

    # Pack the six tiny biases into one [8, 256] operand (row r = layer r+1).
    bias_pack = jnp.zeros((8, 256), f32)
    for r, width in enumerate((128, 64, 256, 128, 64, 1)):
        bias_pack = bias_pack.at[r, :width].set(params[f"b{r + 1}"].reshape(-1))

    def bspec(cols):           # batch-tiled activation operands / output
        return pl.BlockSpec((tb, cols), lambda i: (i, 0))

    def wspec(shape):          # VMEM-resident weights (constant index_map)
        return pl.BlockSpec(shape, lambda i: (0, 0))

    weight_bytes = ((w1_pad.size + w2b.size + w3_full.size + w4b.size
                     + w5b.size) * 2 + (w6_row.size + bias_pack.size) * 4)
    flops = 2 * B * (state_dim * 128 + 128 * 64 + k3 * 256
                     + 256 * 128 + 128 * 64 + 64)
    bytes_accessed = int(B * ((state_dim + act_dim) * 4 + 4) + weight_bytes)
    cost = pl.CostEstimate(flops=int(flops), transcendentals=0,
                           bytes_accessed=bytes_accessed)

    return pl.pallas_call(
        _make_kernel(fuse_l1),
        out_shape=jax.ShapeDtypeStruct((B, 1), f32),
        grid=grid,
        in_specs=[
            bspec(state_dim),
            bspec(act_dim),
            wspec(w1_pad.shape),
            wspec(w2b.shape),
            wspec(w3_full.shape),
            wspec(w4b.shape),
            wspec(w5b.shape),
            wspec(w6_row.shape),
            wspec(bias_pack.shape),
        ],
        out_specs=pl.BlockSpec((tb, 1), lambda i: (i, 0)),
        compiler_params=pltpu.CompilerParams(
            dimension_semantics=("parallel",)),
        cost_estimate=cost,
    )(state, action, w1_pad, w2b, w3_full, w4b, w5b, w6_row, bias_pack)


def _reference(state, action, params, lob_depth=10):
    """Pure-JAX f32 reference mirroring the PyTorch forward."""
    lob_dim = lob_depth * 4
    lob = state[:, :lob_dim]
    other = state[:, lob_dim:]
    h = jax.nn.relu(lob @ params["w1"] + params["b1"])
    enc = jax.nn.relu(h @ params["w2"] + params["b2"])
    comb = jnp.concatenate([enc, other, action], axis=1)
    c = jax.nn.relu(comb @ params["w3"] + params["b3"])
    c = jax.nn.relu(c @ params["w4"] + params["b4"])
    c = jax.nn.relu(c @ params["w5"] + params["b5"])
    return c @ params["w6"] + params["b6"]


if __name__ == "__main__":
    key = jax.random.PRNGKey(0)
    k_state, k_action, k_params = jax.random.split(key, 3)

    lob_depth = 10
    state_dim = 48          # lob_features_dim = 40, other_features_dim = 8
    action_dim = 4
    params = init_params(k_params, state_dim, action_dim, lob_depth)

    # Case 1: tiny batch (single grid step).  Also probes whether the fused
    # lane-concat L1 lowers on this JAX/chip; otherwise use the 3-dot fallback.
    b1 = 4
    state1 = jax.random.normal(k_state, (b1, state_dim), jnp.float32)
    action1 = jax.random.normal(k_action, (b1, action_dim), jnp.float32)
    try:
        q1 = jax.block_until_ready(
            market_making_critic(state1, action1, params,
                                 lob_depth=lob_depth, fuse_l1=True))
        fuse = True
    except Exception:
        q1 = jax.block_until_ready(
            market_making_critic(state1, action1, params,
                                 lob_depth=lob_depth, fuse_l1=False))
        fuse = False
    ref1 = _reference(state1, action1, params, lob_depth)
    assert q1.shape == (b1, 1)
    # bf16 matmuls with f32 accumulation: allow small numerical deviation.
    assert jnp.allclose(q1, ref1, atol=5e-2, rtol=5e-2), \
        float(jnp.max(jnp.abs(q1 - ref1)))

    # Case 2: multiple grid steps + partial final block (exercises pipelining).
    b2 = 20
    k_s2, k_a2 = jax.random.split(jax.random.PRNGKey(1))
    state2 = jax.random.normal(k_s2, (b2, state_dim), jnp.float32)
    action2 = jax.random.normal(k_a2, (b2, action_dim), jnp.float32)
    q2 = jax.block_until_ready(
        market_making_critic(state2, action2, params, lob_depth=lob_depth,
                             tile_b=16, fuse_l1=fuse))
    ref2 = _reference(state2, action2, params, lob_depth)
    assert q2.shape == (b2, 1)
    assert jnp.allclose(q2, ref2, atol=5e-2, rtol=5e-2), \
        float(jnp.max(jnp.abs(q2 - ref2)))

    # Case 3: batch >= 256 -> tile chooser yields >= 2 grid steps (uses both
    # v7x TensorCores; harmless single-core loop on v5e/v6e).
    b3 = 512
    k_s3, k_a3 = jax.random.split(jax.random.PRNGKey(2))
    state3 = jax.random.normal(k_s3, (b3, state_dim), jnp.float32)
    action3 = jax.random.normal(k_a3, (b3, action_dim), jnp.float32)
    q3 = jax.block_until_ready(
        market_making_critic(state3, action3, params, lob_depth=lob_depth,
                             fuse_l1=fuse))
    ref3 = _reference(state3, action3, params, lob_depth)
    assert q3.shape == (b3, 1)
    assert jnp.allclose(q3, ref3, atol=5e-2, rtol=5e-2), \
        float(jnp.max(jnp.abs(q3 - ref3)))

    print("KERNEL_OK")
</pallas_src>

<mosaic_0001>
module attributes {stable_mosaic.version = 11 : i64} {
  func.func @kernel(%arg0: i32, %arg1: memref<4x48xf32, #tpu.memory_space<vmem>>, %arg2: memref<4x4xf32, #tpu.memory_space<vmem>>, %arg3: memref<48x128xbf16, #tpu.memory_space<vmem>>, %arg4: memref<128x64xbf16, #tpu.memory_space<vmem>>, %arg5: memref<116x256xbf16, #tpu.memory_space<vmem>>, %arg6: memref<256x128xbf16, #tpu.memory_space<vmem>>, %arg7: memref<128x64xbf16, #tpu.memory_space<vmem>>, %arg8: memref<1x64xf32, #tpu.memory_space<vmem>>, %arg9: memref<8x256xf32, #tpu.memory_space<vmem>>, %arg10: memref<4x1xf32, #tpu.memory_space<vmem>>) attributes {dimension_semantics = [#tpu.dimension_semantics<parallel>], iteration_bounds = array<i64: 1>, scalar_prefetch = 0 : i64, scratch_operands = 0 : i64, tpu.core_type = #tpu.core_type<tc>, window_params = [{transform_indices = @transform_0, window_bounds = array<i64: 4, 48>}, {transform_indices = @transform_1, window_bounds = array<i64: 4, 4>}, {pipeline_mode = #tpu.pipeline_mode<synchronous>, transform_indices = @transform_2, window_bounds = array<i64: 48, 128>}, {pipeline_mode = #tpu.pipeline_mode<synchronous>, transform_indices = @transform_3, window_bounds = array<i64: 128, 64>}, {pipeline_mode = #tpu.pipeline_mode<synchronous>, transform_indices = @transform_4, window_bounds = array<i64: 116, 256>}, {pipeline_mode = #tpu.pipeline_mode<synchronous>, transform_indices = @transform_5, window_bounds = array<i64: 256, 128>}, {pipeline_mode = #tpu.pipeline_mode<synchronous>, transform_indices = @transform_6, window_bounds = array<i64: 128, 64>}, {pipeline_mode = #tpu.pipeline_mode<synchronous>, transform_indices = @transform_7, window_bounds = array<i64: 1, 64>}, {pipeline_mode = #tpu.pipeline_mode<synchronous>, transform_indices = @transform_8, window_bounds = array<i64: 8, 256>}, {transform_indices = @transform_9, window_bounds = array<i64: 4, 1>}]} {
    %c0 = arith.constant 0 : index
    %c0_0 = arith.constant 0 : index
    %0 = vector.load %arg1[%c0, %c0_0] : memref<4x48xf32, #tpu.memory_space<vmem>>, vector<4x48xf32>
    %c0_1 = arith.constant 0 : index
    %c0_2 = arith.constant 0 : index
    %1 = vector.load %arg2[%c0_1, %c0_2] : memref<4x4xf32, #tpu.memory_space<vmem>>, vector<4x4xf32>
    %2 = arith.truncf %0 : vector<4x48xf32> to vector<4x48xbf16>
    %c0_3 = arith.constant 0 : index
    %c0_4 = arith.constant 0 : index
    %3 = vector.load %arg3[%c0_3, %c0_4] : memref<48x128xbf16, #tpu.memory_space<vmem>>, vector<48x128xbf16>
    %cst = arith.constant dense<0.000000e+00> : vector<4x128xf32>
    %4 = tpu.matmul %2, %3, %cst {dimension_numbers = #tpu.dot_dimension_numbers<[1], [0], [0], [1], [0, 0, 1, 1], [], []>} : vector<4x48xbf16>, vector<48x128xbf16>, vector<4x128xf32> -> vector<4x128xf32>
    %c0_5 = arith.constant 0 : index
    %c0_6 = arith.constant 0 : index
    %5 = vector.load %arg9[%c0_5, %c0_6] : memref<8x256xf32, #tpu.memory_space<vmem>>, vector<1x128xf32>
    %6 = vector.broadcast %5 : vector<1x128xf32> to vector<4x128xf32>
    %7 = arith.addf %4, %6 : vector<4x128xf32>
    %cst_7 = arith.constant 0.000000e+00 : f32
    %8 = vector.broadcast %cst_7 : f32 to vector<4x128xf32>
    %9 = arith.maximumf %7, %8 : vector<4x128xf32>
    %10 = arith.truncf %9 : vector<4x128xf32> to vector<4x128xbf16>
    %c0_8 = arith.constant 0 : index
    %c0_9 = arith.constant 0 : index
    %11 = vector.load %arg4[%c0_8, %c0_9] : memref<128x64xbf16, #tpu.memory_space<vmem>>, vector<128x64xbf16>
    %cst_10 = arith.constant dense<0.000000e+00> : vector<4x64xf32>
    %12 = tpu.matmul %10, %11, %cst_10 {dimension_numbers = #tpu.dot_dimension_numbers<[1], [0], [0], [1], [0, 0, 1, 1], [], []>} : vector<4x128xbf16>, vector<128x64xbf16>, vector<4x64xf32> -> vector<4x64xf32>
    %c1 = arith.constant 1 : index
    %c0_11 = arith.constant 0 : index
    %13 = vector.load %arg9[%c1, %c0_11] : memref<8x256xf32, #tpu.memory_space<vmem>>, vector<1x64xf32>
    %14 = vector.broadcast %13 : vector<1x64xf32> to vector<4x64xf32>
    %15 = arith.addf %12, %14 : vector<4x64xf32>
    %cst_12 = arith.constant 0.000000e+00 : f32
    %16 = vector.broadcast %cst_12 : f32 to vector<4x64xf32>
    %17 = arith.maximumf %15, %16 : vector<4x64xf32>
    %18 = tpu.concatenate %17, %0, %1 in 1 : vector<4x64xf32>, vector<4x48xf32>, vector<4x4xf32> -> vector<4x116xf32>
    %19 = arith.truncf %18 : vector<4x116xf32> to vector<4x116xbf16>
    %c0_13 = arith.constant 0 : index
    %c0_14 = arith.constant 0 : index
    %20 = vector.load %arg5[%c0_13, %c0_14] : memref<116x256xbf16, #tpu.memory_space<vmem>>, vector<116x256xbf16>
    %cst_15 = arith.constant dense<0.000000e+00> : vector<4x256xf32>
    %21 = tpu.matmul %19, %20, %cst_15 {dimension_numbers = #tpu.dot_dimension_numbers<[1], [0], [0], [1], [0, 0, 1, 1], [], []>} : vector<4x116xbf16>, vector<116x256xbf16>, vector<4x256xf32> -> vector<4x256xf32>
    %c2 = arith.constant 2 : index
    %c0_16 = arith.constant 0 : index
    %22 = vector.load %arg9[%c2, %c0_16] : memref<8x256xf32, #tpu.memory_space<vmem>>, vector<1x256xf32>
    %23 = vector.broadcast %22 : vector<1x256xf32> to vector<4x256xf32>
    %24 = arith.addf %21, %23 : vector<4x256xf32>
    %cst_17 = arith.constant 0.000000e+00 : f32
    %25 = vector.broadcast %cst_17 : f32 to vector<4x256xf32>
    %26 = arith.maximumf %24, %25 : vector<4x256xf32>
    %27 = arith.truncf %26 : vector<4x256xf32> to vector<4x256xbf16>
    %c0_18 = arith.constant 0 : index
    %c0_19 = arith.constant 0 : index
    %28 = vector.load %arg6[%c0_18, %c0_19] : memref<256x128xbf16, #tpu.memory_space<vmem>>, vector<256x128xbf16>
    %cst_20 = arith.constant dense<0.000000e+00> : vector<4x128xf32>
    %29 = tpu.matmul %27, %28, %cst_20 {dimension_numbers = #tpu.dot_dimension_numbers<[1], [0], [0], [1], [0, 0, 1, 1], [], []>} : vector<4x256xbf16>, vector<256x128xbf16>, vector<4x128xf32> -> vector<4x128xf32>
    %c3 = arith.constant 3 : index
    %c0_21 = arith.constant 0 : index
    %30 = vector.load %arg9[%c3, %c0_21] : memref<8x256xf32, #tpu.memory_space<vmem>>, vector<1x128xf32>
    %31 = vector.broadcast %30 : vector<1x128xf32> to vector<4x128xf32>
    %32 = arith.addf %29, %31 : vector<4x128xf32>
    %cst_22 = arith.constant 0.000000e+00 : f32
    %33 = vector.broadcast %cst_22 : f32 to vector<4x128xf32>
    %34 = arith.maximumf %32, %33 : vector<4x128xf32>
    %35 = arith.truncf %34 : vector<4x128xf32> to vector<4x128xbf16>
    %c0_23 = arith.constant 0 : index
    %c0_24 = arith.constant 0 : index
    %36 = vector.load %arg7[%c0_23, %c0_24] : memref<128x64xbf16, #tpu.memory_space<vmem>>, vector<128x64xbf16>
    %cst_25 = arith.constant dense<0.000000e+00> : vector<4x64xf32>
    %37 = tpu.matmul %35, %36, %cst_25 {dimension_numbers = #tpu.dot_dimension_numbers<[1], [0], [0], [1], [0, 0, 1, 1], [], []>} : vector<4x128xbf16>, vector<128x64xbf16>, vector<4x64xf32> -> vector<4x64xf32>
    %c4 = arith.constant 4 : index
    %c0_26 = arith.constant 0 : index
    %38 = vector.load %arg9[%c4, %c0_26] : memref<8x256xf32, #tpu.memory_space<vmem>>, vector<1x64xf32>
    %39 = vector.broadcast %38 : vector<1x64xf32> to vector<4x64xf32>
    %40 = arith.addf %37, %39 : vector<4x64xf32>
    %cst_27 = arith.constant 0.000000e+00 : f32
    %41 = vector.broadcast %cst_27 : f32 to vector<4x64xf32>
    %42 = arith.maximumf %40, %41 : vector<4x64xf32>
    %c0_28 = arith.constant 0 : index
    %c0_29 = arith.constant 0 : index
    %43 = vector.load %arg8[%c0_28, %c0_29] : memref<1x64xf32, #tpu.memory_space<vmem>>, vector<1x64xf32>
    %44 = vector.broadcast %43 : vector<1x64xf32> to vector<4x64xf32>
    %45 = arith.mulf %42, %44 : vector<4x64xf32>
    %cst_30 = arith.constant dense<0.000000e+00> : vector<4xf32>
    %46 = vector.multi_reduction <add>, %45, %cst_30 [1] : vector<4x64xf32> to vector<4xf32>
    %47 = vector.shape_cast %46 : vector<4xf32> to vector<4x1xf32>
    %c5 = arith.constant 5 : index
    %c0_31 = arith.constant 0 : index
    %48 = vector.load %arg9[%c5, %c0_31] : memref<8x256xf32, #tpu.memory_space<vmem>>, vector<1x1xf32>
    %49 = vector.broadcast %48 : vector<1x1xf32> to vector<4x1xf32>
    %50 = arith.addf %47, %49 : vector<4x1xf32>
    %c0_32 = arith.constant 0 : index
    %c0_33 = arith.constant 0 : index
    %51 = vector.load %arg10[%c0_32, %c0_33] : memref<4x1xf32, #tpu.memory_space<vmem>>, vector<4x1xf32>
    tpu.vector_store %arg10[%c0_32, %c0_33], %50 {strides = array<i32>} : memref<4x1xf32, #tpu.memory_space<vmem>>, vector<4x1xf32>,
    return
  }
  func.func @transform_0(%arg0: i32) -> (i32, i32) {
    %c0_i32 = arith.constant 0 : i32
    %c0_i32_0 = arith.constant 0 : i32
    return %arg0, %c0_i32 : i32, i32
  }
  func.func @transform_1(%arg0: i32) -> (i32, i32) {
    %c0_i32 = arith.constant 0 : i32
    %c0_i32_0 = arith.constant 0 : i32
    return %arg0, %c0_i32 : i32, i32
  }
  func.func @transform_2(%arg0: i32) -> (i32, i32) {
    %c0_i32 = arith.constant 0 : i32
    %c0_i32_0 = arith.constant 0 : i32
    %c0_i32_1 = arith.constant 0 : i32
    return %c0_i32, %c0_i32_0 : i32, i32
  }
  func.func @transform_3(%arg0: i32) -> (i32, i32) {
    %c0_i32 = arith.constant 0 : i32
    %c0_i32_0 = arith.constant 0 : i32
    %c0_i32_1 = arith.constant 0 : i32
    return %c0_i32, %c0_i32_0 : i32, i32
  }
  func.func @transform_4(%arg0: i32) -> (i32, i32) {
    %c0_i32 = arith.constant 0 : i32
    %c0_i32_0 = arith.constant 0 : i32
    %c0_i32_1 = arith.constant 0 : i32
    return %c0_i32, %c0_i32_0 : i32, i32
  }
  func.func @transform_5(%arg0: i32) -> (i32, i32) {
    %c0_i32 = arith.constant 0 : i32
    %c0_i32_0 = arith.constant 0 : i32
    %c0_i32_1 = arith.constant 0 : i32
    return %c0_i32, %c0_i32_0 : i32, i32
  }
  func.func @transform_6(%arg0: i32) -> (i32, i32) {
    %c0_i32 = arith.constant 0 : i32
    %c0_i32_0 = arith.constant 0 : i32
    %c0_i32_1 = arith.constant 0 : i32
    return %c0_i32, %c0_i32_0 : i32, i32
  }
  func.func @transform_7(%arg0: i32) -> (i32, i32) {
    %c0_i32 = arith.constant 0 : i32
    %c0_i32_0 = arith.constant 0 : i32
    %c0_i32_1 = arith.constant 0 : i32
    return %c0_i32, %c0_i32_0 : i32, i32
  }
  func.func @transform_8(%arg0: i32) -> (i32, i32) {
    %c0_i32 = arith.constant 0 : i32
    %c0_i32_0 = arith.constant 0 : i32
    %c0_i32_1 = arith.constant 0 : i32
    return %c0_i32, %c0_i32_0 : i32, i32
  }
  func.func @transform_9(%arg0: i32) -> (i32, i32) {
    %c0_i32 = arith.constant 0 : i32
    %c0_i32_0 = arith.constant 0 : i32
    return %arg0, %c0_i32 : i32, i32
  }
}

module attributes {stable_mosaic.version = 11 : i64} {
  func.func @kernel(%arg0: i32, %arg1: memref<4x48xf32, #tpu.memory_space<vmem>>, %arg2: memref<4x4xf32, #tpu.memory_space<vmem>>, %arg3: memref<48x128xbf16, #tpu.memory_space<vmem>>, %arg4: memref<128x64xbf16, #tpu.memory_space<vmem>>, %arg5: memref<116x256xbf16, #tpu.memory_space<vmem>>, %arg6: memref<256x128xbf16, #tpu.memory_space<vmem>>, %arg7: memref<128x64xbf16, #tpu.memory_space<vmem>>, %arg8: memref<1x64xf32, #tpu.memory_space<vmem>>, %arg9: memref<8x256xf32, #tpu.memory_space<vmem>>, %arg10: memref<4x1xf32, #tpu.memory_space<vmem>>) attributes {dimension_semantics = [#tpu.dimension_semantics<parallel>], iteration_bounds = array<i64: 1>, scalar_prefetch = 0 : i64, scratch_operands = 0 : i64, tpu.core_type = #tpu.core_type<tc>, window_params = [{transform_indices = @transform_0, window_bounds = array<i64: 4, 48>}, {transform_indices = @transform_1, window_bounds = array<i64: 4, 4>}, {pipeline_mode = #tpu.pipeline_mode<synchronous>, transform_indices = @transform_2, window_bounds = array<i64: 48, 128>}, {pipeline_mode = #tpu.pipeline_mode<synchronous>, transform_indices = @transform_3, window_bounds = array<i64: 128, 64>}, {pipeline_mode = #tpu.pipeline_mode<synchronous>, transform_indices = @transform_4, window_bounds = array<i64: 116, 256>}, {pipeline_mode = #tpu.pipeline_mode<synchronous>, transform_indices = @transform_5, window_bounds = array<i64: 256, 128>}, {pipeline_mode = #tpu.pipeline_mode<synchronous>, transform_indices = @transform_6, window_bounds = array<i64: 128, 64>}, {pipeline_mode = #tpu.pipeline_mode<synchronous>, transform_indices = @transform_7, window_bounds = array<i64: 1, 64>}, {pipeline_mode = #tpu.pipeline_mode<synchronous>, transform_indices = @transform_8, window_bounds = array<i64: 8, 256>}, {transform_indices = @transform_9, window_bounds = array<i64: 4, 1>}]} {
    %c0 = arith.constant 0 : index
    %c0_0 = arith.constant 0 : index
    %0 = vector.load %arg1[%c0, %c0_0] : memref<4x48xf32, #tpu.memory_space<vmem>>, vector<4x48xf32>
    %c0_1 = arith.constant 0 : index
    %c0_2 = arith.constant 0 : index
    %1 = vector.load %arg2[%c0_1, %c0_2] : memref<4x4xf32, #tpu.memory_space<vmem>>, vector<4x4xf32>
    %2 = arith.truncf %0 : vector<4x48xf32> to vector<4x48xbf16>
    %c0_3 = arith.constant 0 : index
    %c0_4 = arith.constant 0 : index
    %3 = vector.load %arg3[%c0_3, %c0_4] : memref<48x128xbf16, #tpu.memory_space<vmem>>, vector<48x128xbf16>
    %cst = arith.constant dense<0.000000e+00> : vector<4x128xf32>
    %4 = tpu.matmul %2, %3, %cst {dimension_numbers = #tpu.dot_dimension_numbers<[1], [0], [0], [1], [0, 0, 1, 1], [], []>} : vector<4x48xbf16>, vector<48x128xbf16>, vector<4x128xf32> -> vector<4x128xf32>
    %c0_5 = arith.constant 0 : index
    %c0_6 = arith.constant 0 : index
    %5 = vector.load %arg9[%c0_5, %c0_6] : memref<8x256xf32, #tpu.memory_space<vmem>>, vector<1x128xf32>
    %6 = vector.broadcast %5 : vector<1x128xf32> to vector<4x128xf32>
    %7 = arith.addf %4, %6 : vector<4x128xf32>
    %cst_7 = arith.constant 0.000000e+00 : f32
    %8 = vector.broadcast %cst_7 : f32 to vector<4x128xf32>
    %9 = arith.maximumf %7, %8 : vector<4x128xf32>
    %10 = arith.truncf %9 : vector<4x128xf32> to vector<4x128xbf16>
    %c0_8 = arith.constant 0 : index
    %c0_9 = arith.constant 0 : index
    %11 = vector.load %arg4[%c0_8, %c0_9] : memref<128x64xbf16, #tpu.memory_space<vmem>>, vector<128x64xbf16>
    %cst_10 = arith.constant dense<0.000000e+00> : vector<4x64xf32>
    %12 = tpu.matmul %10, %11, %cst_10 {dimension_numbers = #tpu.dot_dimension_numbers<[1], [0], [0], [1], [0, 0, 1, 1], [], []>} : vector<4x128xbf16>, vector<128x64xbf16>, vector<4x64xf32> -> vector<4x64xf32>
    %c1 = arith.constant 1 : index
    %c0_11 = arith.constant 0 : index
    %13 = vector.load %arg9[%c1, %c0_11] : memref<8x256xf32, #tpu.memory_space<vmem>>, vector<1x64xf32>
    %14 = vector.broadcast %13 : vector<1x64xf32> to vector<4x64xf32>
    %15 = arith.addf %12, %14 : vector<4x64xf32>
    %cst_12 = arith.constant 0.000000e+00 : f32
    %16 = vector.broadcast %cst_12 : f32 to vector<4x64xf32>
    %17 = arith.maximumf %15, %16 : vector<4x64xf32>
    %18 = arith.truncf %17 : vector<4x64xf32> to vector<4x64xbf16>
    %c0_13 = arith.constant 0 : index
    %c0_14 = arith.constant 0 : index
    %19 = vector.load %arg5[%c0_13, %c0_14] : memref<116x256xbf16, #tpu.memory_space<vmem>>, vector<64x256xbf16>
    %cst_15 = arith.constant dense<0.000000e+00> : vector<4x256xf32>
    %20 = tpu.matmul %18, %19, %cst_15 {dimension_numbers = #tpu.dot_dimension_numbers<[1], [0], [0], [1], [0, 0, 1, 1], [], []>} : vector<4x64xbf16>, vector<64x256xbf16>, vector<4x256xf32> -> vector<4x256xf32>
    %c64 = arith.constant 64 : index
    %c0_16 = arith.constant 0 : index
    %21 = vector.load %arg5[%c64, %c0_16] : memref<116x256xbf16, #tpu.memory_space<vmem>>, vector<48x256xbf16>
    %cst_17 = arith.constant dense<0.000000e+00> : vector<4x256xf32>
    %22 = tpu.matmul %2, %21, %cst_17 {dimension_numbers = #tpu.dot_dimension_numbers<[1], [0], [0], [1], [0, 0, 1, 1], [], []>} : vector<4x48xbf16>, vector<48x256xbf16>, vector<4x256xf32> -> vector<4x256xf32>
    %23 = arith.addf %20, %22 : vector<4x256xf32>
    %24 = arith.truncf %1 : vector<4x4xf32> to vector<4x4xbf16>
    %c112 = arith.constant 112 : index
    %c0_18 = arith.constant 0 : index
    %25 = vector.load %arg5[%c112, %c0_18] : memref<116x256xbf16, #tpu.memory_space<vmem>>, vector<4x256xbf16>
    %cst_19 = arith.constant dense<0.000000e+00> : vector<4x256xf32>
    %26 = tpu.matmul %24, %25, %cst_19 {dimension_numbers = #tpu.dot_dimension_numbers<[1], [0], [0], [1], [0, 0, 1, 1], [], []>} : vector<4x4xbf16>, vector<4x256xbf16>, vector<4x256xf32> -> vector<4x256xf32>
    %27 = arith.addf %23, %26 : vector<4x256xf32>
    %c2 = arith.constant 2 : index
    %c0_20 = arith.constant 0 : index
    %28 = vector.load %arg9[%c2, %c0_20] : memref<8x256xf32, #tpu.memory_space<vmem>>, vector<1x256xf32>
    %29 = vector.broadcast %28 : vector<1x256xf32> to vector<4x256xf32>
    %30 = arith.addf %27, %29 : vector<4x256xf32>
    %cst_21 = arith.constant 0.000000e+00 : f32
    %31 = vector.broadcast %cst_21 : f32 to vector<4x256xf32>
    %32 = arith.maximumf %30, %31 : vector<4x256xf32>
    %33 = arith.truncf %32 : vector<4x256xf32> to vector<4x256xbf16>
    %c0_22 = arith.constant 0 : index
    %c0_23 = arith.constant 0 : index
    %34 = vector.load %arg6[%c0_22, %c0_23] : memref<256x128xbf16, #tpu.memory_space<vmem>>, vector<256x128xbf16>
    %cst_24 = arith.constant dense<0.000000e+00> : vector<4x128xf32>
    %35 = tpu.matmul %33, %34, %cst_24 {dimension_numbers = #tpu.dot_dimension_numbers<[1], [0], [0], [1], [0, 0, 1, 1], [], []>} : vector<4x256xbf16>, vector<256x128xbf16>, vector<4x128xf32> -> vector<4x128xf32>
    %c3 = arith.constant 3 : index
    %c0_25 = arith.constant 0 : index
    %36 = vector.load %arg9[%c3, %c0_25] : memref<8x256xf32, #tpu.memory_space<vmem>>, vector<1x128xf32>
    %37 = vector.broadcast %36 : vector<1x128xf32> to vector<4x128xf32>
    %38 = arith.addf %35, %37 : vector<4x128xf32>
    %cst_26 = arith.constant 0.000000e+00 : f32
    %39 = vector.broadcast %cst_26 : f32 to vector<4x128xf32>
    %40 = arith.maximumf %38, %39 : vector<4x128xf32>
    %41 = arith.truncf %40 : vector<4x128xf32> to vector<4x128xbf16>
    %c0_27 = arith.constant 0 : index
    %c0_28 = arith.constant 0 : index
    %42 = vector.load %arg7[%c0_27, %c0_28] : memref<128x64xbf16, #tpu.memory_space<vmem>>, vector<128x64xbf16>
    %cst_29 = arith.constant dense<0.000000e+00> : vector<4x64xf32>
    %43 = tpu.matmul %41, %42, %cst_29 {dimension_numbers = #tpu.dot_dimension_numbers<[1], [0], [0], [1], [0, 0, 1, 1], [], []>} : vector<4x128xbf16>, vector<128x64xbf16>, vector<4x64xf32> -> vector<4x64xf32>
    %c4 = arith.constant 4 : index
    %c0_30 = arith.constant 0 : index
    %44 = vector.load %arg9[%c4, %c0_30] : memref<8x256xf32, #tpu.memory_space<vmem>>, vector<1x64xf32>
    %45 = vector.broadcast %44 : vector<1x64xf32> to vector<4x64xf32>
    %46 = arith.addf %43, %45 : vector<4x64xf32>
    %cst_31 = arith.constant 0.000000e+00 : f32
    %47 = vector.broadcast %cst_31 : f32 to vector<4x64xf32>
    %48 = arith.maximumf %46, %47 : vector<4x64xf32>
    %c0_32 = arith.constant 0 : index
    %c0_33 = arith.constant 0 : index
    %49 = vector.load %arg8[%c0_32, %c0_33] : memref<1x64xf32, #tpu.memory_space<vmem>>, vector<1x64xf32>
    %50 = vector.broadcast %49 : vector<1x64xf32> to vector<4x64xf32>
    %51 = arith.mulf %48, %50 : vector<4x64xf32>
    %cst_34 = arith.constant dense<0.000000e+00> : vector<4xf32>
    %52 = vector.multi_reduction <add>, %51, %cst_34 [1] : vector<4x64xf32> to vector<4xf32>
    %53 = vector.shape_cast %52 : vector<4xf32> to vector<4x1xf32>
    %c5 = arith.constant 5 : index
    %c0_35 = arith.constant 0 : index
    %54 = vector.load %arg9[%c5, %c0_35] : memref<8x256xf32, #tpu.memory_space<vmem>>, vector<1x1xf32>
    %55 = vector.broadcast %54 : vector<1x1xf32> to vector<4x1xf32>
    %56 = arith.addf %53, %55 : vector<4x1xf32>
    %c0_36 = arith.constant 0 : index
    %c0_37 = arith.constant 0 : index
    %57 = vector.load %arg10[%c0_36, %c0_37] : memref<4x1xf32, #tpu.memory_space<vmem>>, vector<4x1xf32>
    tpu.vector_store %arg10[%c0_36, %c0_37], %56 {strides = array<i32>} : memref<4x1xf32, #tpu.memory_space<vmem>>, vector<4x1xf32>,
    return
  }
  func.func @transform_0(%arg0: i32) -> (i32, i32) {
    %c0_i32 = arith.constant 0 : i32
    %c0_i32_0 = arith.constant 0 : i32
    return %arg0, %c0_i32 : i32, i32
  }
  func.func @transform_1(%arg0: i32) -> (i32, i32) {
    %c0_i32 = arith.constant 0 : i32
    %c0_i32_0 = arith.constant 0 : i32
    return %arg0, %c0_i32 : i32, i32
  }
  func.func @transform_2(%arg0: i32) -> (i32, i32) {
    %c0_i32 = arith.constant 0 : i32
    %c0_i32_0 = arith.constant 0 : i32
    %c0_i32_1 = arith.constant 0 : i32
    return %c0_i32, %c0_i32_0 : i32, i32
  }
  func.func @transform_3(%arg0: i32) -> (i32, i32) {
    %c0_i32 = arith.constant 0 : i32
    %c0_i32_0 = arith.constant 0 : i32
    %c0_i32_1 = arith.constant 0 : i32
    return %c0_i32, %c0_i32_0 : i32, i32
  }
  func.func @transform_4(%arg0: i32) -> (i32, i32) {
    %c0_i32 = arith.constant 0 : i32
    %c0_i32_0 = arith.constant 0 : i32
    %c0_i32_1 = arith.constant 0 : i32
    return %c0_i32, %c0_i32_0 : i32, i32
  }
  func.func @transform_5(%arg0: i32) -> (i32, i32) {
    %c0_i32 = arith.constant 0 : i32
    %c0_i32_0 = arith.constant 0 : i32
    %c0_i32_1 = arith.constant 0 : i32
    return %c0_i32, %c0_i32_0 : i32, i32
  }
  func.func @transform_6(%arg0: i32) -> (i32, i32) {
    %c0_i32 = arith.constant 0 : i32
    %c0_i32_0 = arith.constant 0 : i32
    %c0_i32_1 = arith.constant 0 : i32
    return %c0_i32, %c0_i32_0 : i32, i32
  }
  func.func @transform_7(%arg0: i32) -> (i32, i32) {
    %c0_i32 = arith.constant 0 : i32
    %c0_i32_0 = arith.constant 0 : i32
    %c0_i32_1 = arith.constant 0 : i32
    return %c0_i32, %c0_i32_0 : i32, i32
  }
  func.func @transform_8(%arg0: i32) -> (i32, i32) {
    %c0_i32 = arith.constant 0 : i32
    %c0_i32_0 = arith.constant 0 : i32
    %c0_i32_1 = arith.constant 0 : i32
    return %c0_i32, %c0_i32_0 : i32, i32
  }
  func.func @transform_9(%arg0: i32) -> (i32, i32) {
    %c0_i32 = arith.constant 0 : i32
    %c0_i32_0 = arith.constant 0 : i32
    return %arg0, %c0_i32 : i32, i32
  }
}

</mosaic_0001>

<bundles_post_ra>
// kernel: market_making_critic.1
= control target key start
LH: loop header
LB: loop body
LE: loop exit
PB: predicated region body
PF: predicated region fallthrough
CT: control target
= control target key end

     0   :  { %v895_v0 = vmov 0.0   ;;  %vm896_vm0 = vmmov 0   ;;  %vm61_vm1 = vcmask 392192   ;;  %s897_s10 = smov 64   ;;  %vm333_vm2 = vcmask 1041408   ;;  %s1155_s2 = inlined_call_operand.vmem [shape: bf16[48,128], index: 2, kind: input, shape index: {}]   ;;  %s1156_s3 = inlined_call_operand.vmem [shape: bf16[128,64], index: 3, kind: input, shape index: {}]   ;;  %s1157_s0 = inlined_call_operand.vmem [shape: f32[4,48], index: 0, kind: input, shape index: {}]   ;;  %s1158_s1 = inlined_call_operand.vmem [shape: f32[4,4], index: 1, kind: input, shape index: {}]   ;;  %s1159_s4 = inlined_call_operand.vmem [shape: bf16[116,256], index: 4, kind: input, shape index: {}]   ;;  %s1160_s8 = inlined_call_operand.vmem [shape: f32[8,256], index: 8, kind: input, shape index: {}]   ;;  %s1161_s5 = inlined_call_operand.vmem [shape: bf16[256,128], index: 5, kind: input, shape index: {}]   ;;  %s1162_s6 = inlined_call_operand.vmem [shape: bf16[128,64], index: 6, kind: input, shape index: {}]   ;;  %s1163_s7 = inlined_call_operand.vmem [shape: f32[1,64], index: 7, kind: input, shape index: {}]   ;;  %s1164_s9 = inlined_call_operand.vmem [shape: f32[4,1], index: 9, kind: output, shape index: {}]  }
   0x1   :  { %782 = vmatprep.subr.bf16.mxu0 %v895_v0  ;;  %v837_v1 = vld [vmem:[%s1155_s2 + $0x10] sm:$0xff]   ;;  %788 = vmatprep.mubr.msk.bf16.mxu0 %vm896_vm0, %v895_v0  ;;  %v838_v2 = vld [vmem:[%s1155_s2 + $0x8] sm:$0xff]   ;;  %v839_v3 = vld [vmem:[%s1155_s2] sm:$0xff]   ;;  %v899_v41 = vmov 0   ;;  %vm221_vm3 = vcmask 523264   ;;  %vm223_vm4 = vcmask 916480  }
   0x2   :  { %792 = vmatprep.subr.bf16.mxu1 %v895_v0  ;;  %808 = vmatprep.mubr.msk.bf16.mxu1 %vm896_vm0, %v895_v0  ;;  %v840_v4 = vld [vmem:[%s1156_s3 + $0x38] sm:$0xff]   ;;  %v33_v5 = vld [vmem:[%s1157_s0] sm:$0xf]  ;;  %v841_v6 = vld [vmem:[%s1156_s3 + $0x30] sm:$0xff]   ;;  %vm329_vm5 = vcmask 949248   ;;  %vm670_vm6 = vcmask 519168  }
   0x3   :  { %783 = vmatpush3.bf16.msra.mxu0 %v837_v1  ;;  %793 = vmatpush3.bf16.msra.mxu1 %v840_v4  ;;  %v35_v7 = vpack.c.bf16 %v33_v5, %v33_v5  ;;  %v842_v8 = vld [vmem:[%s1156_s3 + $0x28] sm:$0xff]   ;;  %v843_v9 = vld [vmem:[%s1156_s3 + $0x20] sm:$0xff]   ;;  %v844_v10 = vld [vmem:[%s1156_s3 + $0x18] sm:$0xff]   ;;  %vm676_vm7 = vcmask 3072  }
   0x4   :  { %784 = vmatprep.subr.bf16.mxu0 %v895_v0  ;;  %794 = vmatprep.subr.bf16.mxu1 %v895_v0  ;;  %v845_v11 = vld [vmem:[%s1156_s3 + $0x10] sm:$0xff]   ;;  %v846_v12 = vld [vmem:[%s1156_s3 + $0x8] sm:$0xff]   ;;  %v847_v13 = vld [vmem:[%s1156_s3] sm:$0xff]   ;;  %s898_s3 = smov 112  }
   0x5   :  { %214 = vrot.lane.b32.xlu0 %v33_v5, %s897_s10  ;;  %v240_v14 = vld [vmem:[%s1159_s4 + $0x70] sm:$0x33]  ;;  %v34_v15 = vld [vmem:[%s1158_s1] sm:$0xf]  ;;  %v852_v18 = vld [vmem:[%s1159_s4 + $0x64] ss:$8 sps:$4 sm:$0xff]  }
   0x6   :  { %v710_v16 = vcombine.high %v240_v14, %v240_v14  ;;  %v709_v17 = vcombine.low %v240_v14, %v240_v14  ;;  %v850_v20 = vld [vmem:[%s1159_s4 + $0x60] ss:$8 sps:$4 sm:$0xff]   ;;  %v855_v21 = vld [vmem:[%s1159_s4 + $0x54] ss:$8 sps:$4 sm:$0xff]   ;;  %v853_v22 = vld [vmem:[%s1159_s4 + $0x50] ss:$8 sps:$4 sm:$0xff]  }
   0x7   :  { %785 = vmatpush3.bf16.msra.mxu0 %v838_v2  ;;  %795 = vmatpush3.bf16.msra.mxu1 %v841_v6  ;;  %v858_v23 = vld [vmem:[%s1159_s4 + $0x44] ss:$8 sps:$4 sm:$0xff]   ;;  %v856_v24 = vld [vmem:[%s1159_s4 + $0x40] ss:$8 sps:$4 sm:$0xff]   ;;  %v861_v25 = vld [vmem:[%s1159_s4 + $0x34] ss:$8 sps:$4 sm:$0xff]  }
   0x8   :  { %786 = vmatprep.subr.bf16.mxu0 %v895_v0  ;;  %796 = vmatprep.subr.bf16.mxu1 %v895_v0  ;;  %v335_v19 = vsel %vm333_vm2, %v709_v17, 0  ;;  %v859_v26 = vld [vmem:[%s1159_s4 + $0x30] ss:$8 sps:$4 sm:$0xff]   ;;  %v864_v27 = vld [vmem:[%s1159_s4 + $0x24] ss:$8 sps:$4 sm:$0xff]  }
   0x9   :  { %218 = vrot.lane.b32.xlu0 %v34_v15, %s898_s3  ;;  %v862_v28 = vld [vmem:[%s1159_s4 + $0x20] ss:$8 sps:$4 sm:$0xff]   ;;  %v867_v37 = vld [vmem:[%s1159_s4 + $0x14] ss:$8 sps:$4 sm:$0xff]   ;;  %v865_v38 = vld [vmem:[%s1159_s4 + $0x10] ss:$8 sps:$4 sm:$0xff]  }
   0xa   :  { %v42_v29 = vld [vmem:[%s1160_s8] ss:$0 sm:$0xff]  ;;  %v870_v39 = vld [vmem:[%s1159_s4 + $0x4] ss:$8 sps:$4 sm:$0xff]   ;;  %v871_v42 = vld [vmem:[%s1161_s5 + $0x78] sm:$0xff]  }
   0xb   :  { %787 = vmatpush3.bf16.msra.mxu0 %v839_v3  ;;  %797 = vmatpush3.bf16.msra.mxu1 %v842_v8  ;;  %v868_v40 = vld [vmem:[%s1159_s4] ss:$8 sps:$4 sm:$0xff]   ;;  %v872_v43 = vld [vmem:[%s1161_s5 + $0x38] sm:$0xff]   ;;  %v873_v44 = vld [vmem:[%s1161_s5 + $0x70] sm:$0xff]  }
   0xc   :  { %798 = vmatprep.subr.bf16.mxu1 %v895_v0  ;;  %711 = vmatprep.subr.msk.bf16.mxu0 %vm333_vm2, %v710_v16  ;;  %v874_v45 = vld [vmem:[%s1161_s5 + $0x30] sm:$0xff]   ;;  %v875_v46 = vld [vmem:[%s1161_s5 + $0x68] sm:$0xff]   ;;  %v877_v48 = vld [vmem:[%s1161_s5 + $0x60] sm:$0xff]  }
   0xd   :  { %v876_v47 = vld [vmem:[%s1161_s5 + $0x28] sm:$0xff]   ;;  %v878_v49 = vld [vmem:[%s1161_s5 + $0x20] sm:$0xff]   ;;  %v879_v50 = vld [vmem:[%s1161_s5 + $0x58] sm:$0xff]  }
   0xe   :  { %789 = vmatmul.mubr.msk.bf16.vlgmr.msra.gmra.mxu0 %vm61_vm1, %v35_v7  ;;  %v880_v51 = vld [vmem:[%s1161_s5 + $0x18] sm:$0xff]   ;;  %v881_v52 = vld [vmem:[%s1161_s5 + $0x50] sm:$0xff]   ;;  %v123_v55 = vld [vmem:[%s1160_s8 + $0x1] ss:$0 sm:$0xff] }
   0xf   :  { %799 = vmatpush3.bf16.msra.mxu1 %v843_v9  ;;  %341 = vmatpush1.bf16.msra.mxu0 %v335_v19  ;;  %v882_v53 = vld [vmem:[%s1161_s5 + $0x10] sm:$0xff]   ;;  %v883_v3 = vld [vmem:[%s1161_s5 + $0x48] sm:$0xff]   ;;  %v885_v5 = vld [vmem:[%s1161_s5 + $0x40] sm:$0xff]  }
  0x10   :  { %800 = vmatprep.subr.bf16.mxu1 %v895_v0  ;;  %342 = vmatprep.subr.bf16.mxu0 %v852_v18  ;;  %v884_v4 = vld [vmem:[%s1161_s5 + $0x8] sm:$0xff]   ;;  %v886_v6 = vld [vmem:[%s1161_s5] sm:$0xff]   ;;  %v887_v7 = vld [vmem:[%s1162_s6 + $0x38] sm:$0xff]  }
  0x11   :  { %372 = vmatprep.mubr.bf16.mxu0 %v899_v41  ;;  %v888_v8 = vld [vmem:[%s1162_s6 + $0x30] sm:$0xff]   ;;  %v889_v9 = vld [vmem:[%s1162_s6 + $0x28] sm:$0xff]  }
  0x12   :  { %v694_v15 = vld [vmem:[%s1160_s8 + $0x2] ss:$8 sm:$0x3] }
  0x13   :  { %801 = vmatpush3.bf16.msra.mxu1 %v844_v10  ;;  %343 = vmatpush1.bf16.msra.mxu0 %v850_v20  ;;  %v890_v10 = vld [vmem:[%s1162_s6 + $0x20] sm:$0xff]  }
  0x14   :  { %802 = vmatprep.subr.bf16.mxu1 %v895_v0  ;;  %344 = vmatprep.subr.bf16.mxu0 %v855_v21 }
  0x17   :  { %803 = vmatpush3.bf16.msra.mxu1 %v845_v11  ;;  %345 = vmatpush1.bf16.msra.mxu0 %v853_v22  ;;  %v891_v11 = vld [vmem:[%s1162_s6 + $0x18] sm:$0xff]  }
  0x18   :  { %804 = vmatprep.subr.bf16.mxu1 %v895_v0  ;;  %346 = vmatprep.subr.bf16.mxu0 %v858_v23 }
  0x1b   :  { %805 = vmatpush3.bf16.msra.mxu1 %v846_v12  ;;  %347 = vmatpush1.bf16.msra.mxu0 %v856_v24  ;;  %v244_v12 = vlaneseq }
  0x1c   :  { %806 = vmatprep.subr.bf16.mxu1 %v895_v0  ;;  %348 = vmatprep.subr.bf16.mxu0 %v861_v25 }
  0x1f   :  { %807 = vmatpush3.bf16.msra.mxu1 %v847_v13  ;;  %349 = vmatpush1.bf16.msra.mxu0 %v859_v26  ;;  %v245_v13 = vshrl.u32 %v244_v12, 7 }
  0x20   :  { %350 = vmatprep.subr.bf16.mxu0 %v864_v27  ;;  %751 = vmatprep.subr.bf16.mxu1 %v871_v42 }
  0x21   :  { %v246_v14 = vsub.s32 0, %v245_v13  ;;  %v250_v16 = vsub.s32 1, %v245_v13 }
  0x23   :  { %351 = vmatpush1.bf16.msra.mxu0 %v862_v28  ;;  %v247_v17 = vrot.slane %v694_v15, %v246_v14  ;;  %v251_v18 = vrot.slane %v694_v15, %v250_v16 }
  0x24   :  { %352 = vmatprep.subr.bf16.mxu0 %v867_v37 }
  0x27   :  { %353 = vmatpush1.bf16.msra.mxu0 %v865_v38 }
  0x28   :  { %354 = vmatprep.subr.bf16.mxu0 %v870_v39 }
  0x2b   :  { %355 = vmatpush1.bf16.msra.mxu0 %v868_v40 }
  0x2c   :  { %812 = vmatprep.subr.bf16.mxu0 %v895_v0 }
  0x77   :  { %v215_v54 = vpop.permute.xlu0 %214 }
  0x7b   :  { %v219_v60 = vpop.permute.xlu0 %218 }
  0xce   :  { %v99_v30 = vpop.f32.mrf.mxu0 }
  0xcf   :  { %v100_v31 = vadd.f32 %v99_v30, %v42_v29  ;;  %v892_v29 = vld [vmem:[%s1162_s6 + $0x10] sm:$0xff]   ;;  %v893_v30 = vld [vmem:[%s1162_s6 + $0x8] sm:$0xff]  }
  0xd0   :  { %v790_v32 = vpop.f32.mrf.mxu0 }
  0xd1   :  { %v105_v33 = vmax.f32 %v100_v31, 0.0  ;;  %v894_v31 = vld [vmem:[%s1162_s6] sm:$0xff]  }
  0xd2   :  { %v102_v34 = vpop.f32.mrf.mxu0 }
  0xd3   :  { %v106_v35 = vpack.c.bf16 %v105_v33, %v105_v33  ;;  %v417_v33 = vld [vmem:[%s1160_s8 + $0x3] ss:$0 sm:$0xff] }
  0xd4   :  { %v791_v36 = vpop.f32.mrf.mxu0 }
  0xd5   :  { %809 = vmatmul.mubr.bf16.vlgmr.msra.gmra.mxu1 %v106_v35 }
  0xd6   :  { %752 = vmatpush3.bf16.msra.mxu1 %v872_v43 }
  0xd7   :  { %753 = vmatprep.subr.bf16.mxu1 %v873_v44  ;;  %v737_v44 = vld [vmem:[%s1163_s7] ss:$0 sm:$0xff] }
  0xda   :  { %754 = vmatpush3.bf16.msra.mxu1 %v874_v45 }
  0xdb   :  { %755 = vmatprep.subr.bf16.mxu1 %v875_v46 }
  0xde   :  { %756 = vmatpush3.bf16.msra.mxu1 %v876_v47 }
  0xdf   :  { %757 = vmatprep.subr.bf16.mxu1 %v877_v48 }
  0xe2   :  { %758 = vmatpush3.bf16.msra.mxu1 %v878_v49 }
  0xe3   :  { %759 = vmatprep.subr.bf16.mxu1 %v879_v50  ;;  %v674_v50 = vld [vmem:[%s1160_s8 + $0x5] ss:$0 sm:$0xff] }
  0xe6   :  { %760 = vmatpush3.bf16.msra.mxu1 %v880_v51 }
  0xe7   :  { %761 = vmatprep.subr.bf16.mxu1 %v881_v52 }
  0xea   :  { %762 = vmatpush3.bf16.msra.mxu1 %v882_v53 }
  0xeb   :  { %763 = vmatprep.subr.bf16.mxu1 %v883_v3 }
  0xee   :  { %764 = vmatpush3.bf16.msra.mxu1 %v884_v4 }
  0xef   :  { %765 = vmatprep.subr.bf16.mxu1 %v885_v5 }
  0xf2   :  { %766 = vmatpush3.bf16.msra.mxu1 %v886_v6 }
 0x195   :  { %v206_v56 = vpop.f32.mrf.mxu1 }
 0x196   :  { %v207_v57 = vadd.f32 %v206_v56, %v123_v55 }
 0x197   :  { %v810_v58 = vpop.f32.mrf.mxu1 }
 0x198   :  { %v212_v59 = vmax.f32 %v207_v57, 0.0 }
 0x199   :  { %v209_v61 = vpop.f32.mrf.mxu1 }
 0x19a   :  { %v222_v62 = vsel %vm221_vm3, %v212_v59, %v215_v54 }
 0x19b   :  { %v224_v63 = vsel %vm223_vm4, %v222_v62, %v219_v60  ;;  %v811_v1 = vpop.f32.mrf.mxu1 }
 0x19c   :  { %v225_v2 = vpack.c.bf16 %v224_v63, %v224_v63 }
 0x19e   :  { %712 = vmatmul.mubr.msk.bf16.vlgmr.msra.gmra.mxu0 %vm329_vm5, %v225_v2 }
 0x19f   :  { %828 = vmatprep.mubr.msk.bf16.mxu0 %vm896_vm0, %v895_v0  ;;  %813 = vmatpush3.bf16.msra.mxu0 %v887_v7 }
 0x1a0   :  { %814 = vmatprep.subr.bf16.mxu0 %v895_v0 }
 0x1a3   :  { %815 = vmatpush3.bf16.msra.mxu0 %v888_v8 }
 0x1a4   :  { %816 = vmatprep.subr.bf16.mxu0 %v895_v0 }
 0x1a7   :  { %817 = vmatpush3.bf16.msra.mxu0 %v889_v9 }
 0x1a8   :  { %818 = vmatprep.subr.bf16.mxu0 %v895_v0 }
 0x1ab   :  { %819 = vmatpush3.bf16.msra.mxu0 %v890_v10 }
 0x1ac   :  { %820 = vmatprep.subr.bf16.mxu0 %v895_v0 }
 0x1af   :  { %821 = vmatpush3.bf16.msra.mxu0 %v891_v11 }
 0x1b0   :  { %822 = vmatprep.subr.bf16.mxu0 %v895_v0 }
 0x1b3   :  { %823 = vmatpush3.bf16.msra.mxu0 %v892_v29 }
 0x1b4   :  { %824 = vmatprep.subr.bf16.mxu0 %v895_v0 }
 0x1b7   :  { %825 = vmatpush3.bf16.msra.mxu0 %v893_v30 }
 0x1b8   :  { %826 = vmatprep.subr.bf16.mxu0 %v895_v0  ;;  %v572_v0 = vld [vmem:[%s1160_s8 + $0x4] ss:$0 sm:$0xff] }
 0x1bb   :  { %827 = vmatpush3.bf16.msra.mxu0 %v894_v31 }
 0x25e   :  { %v374_v19 = vpop.f32.mrf.mxu0 }
 0x25f   :  { %v375_v20 = vadd.f32 %v374_v19, %v247_v17 }
 0x260   :  { %v376_v21 = vpop.f32.mrf.mxu0 }
 0x261   :  { %v377_v22 = vadd.f32 %v376_v21, %v251_v18  ;;  %v381_v23 = vmax.f32 %v375_v20, 0.0 }
 0x262   :  { %v378_v24 = vpop.f32.mrf.mxu0 }
 0x263   :  { %v382_v25 = vmax.f32 %v377_v22, 0.0  ;;  %v383_v28 = vpack.c.bf16 %v381_v23, %v381_v23 }
 0x264   :  { %v379_v26 = vpop.f32.mrf.mxu0 }
 0x265   :  { %v384_v27 = vpack.c.bf16 %v382_v25, %v382_v25 }
 0x267   :  { %546 = vmatprep.mubr.bf16.mxu1 %v384_v27 }
 0x268   :  { %547 = vmatmul.mubr.bf16.vlgmr.msra.gmra.mxu1 %v383_v28 }
 0x328   :  { %v767_v32 = vpop.f32.mrf.mxu1 }
 0x32a   :  { %v768_v34 = vpop.f32.mrf.mxu1 }
 0x32b   :  { %v769_v35 = vadd.f32 %v768_v34, %v767_v32 }
 0x32c   :  { %v770_v36 = vpop.f32.mrf.mxu1 }
 0x32d   :  { %v549_v37 = vadd.f32 %v769_v35, %v417_v33 }
 0x32e   :  { %v771_v38 = vpop.f32.mrf.mxu1 }
 0x32f   :  { %v554_v39 = vmax.f32 %v549_v37, 0.0 }
 0x331   :  { %v555_v40 = vpack.c.bf16 %v554_v39, %v554_v39 }
 0x333   :  { %829 = vmatmul.mubr.bf16.vlgmr.msra.gmra.mxu0 %v555_v40 }
 0x3f3   :  { %v655_v41 = vpop.f32.mrf.mxu0 }
 0x3f4   :  { %v656_v42 = vadd.f32 %v655_v41, %v572_v0 }
 0x3f5   :  { %v830_v43 = vpop.f32.mrf.mxu0 }
 0x3f6   :  { %v661_v45 = vmax.f32 %v656_v42, 0.0 }
 0x3f7   :  { %v658_v46 = vpop.f32.mrf.mxu0 }
 0x3f8   :  { %v669_v47 = vmul.f32 %v737_v44, %v661_v45 }
 0x3f9   :  { %v831_v48 = vpop.f32.mrf.mxu0 }
 0x3fa   :  { %v671_v49 = vsel %vm670_vm6, %v669_v47, 0.0 }
 0x3fb   :  { %672 = vadd.xlane.f32.xlu1 %v671_v49 }
 0x484   :  { %v673_v51 = vpop.xlane.xlu1 %672 }
 0x485   :  { %v675_v52 = vadd.f32 %v674_v50, %v673_v51 }
 0x487   :  { %677 = vst.msk [vmem:[%s1164_s9] sm:$0xf] %vm676_vm7, %v675_v52 }

// kernel: market_making_critic.1
= control target key start
LH: loop header
LB: loop body
LE: loop exit
PB: predicated region body
PF: predicated region fallthrough
CT: control target
= control target key end

     0   :  { %v974_v0 = vmov 0.0   ;;  %vm975_vm0 = vmmov 0   ;;  %vm61_vm1 = vcmask 392192   ;;  %v976_v15 = vmov 0   ;;  %s1242_s2 = inlined_call_operand.vmem [shape: bf16[48,128], index: 2, kind: input, shape index: {}]   ;;  %s1243_s3 = inlined_call_operand.vmem [shape: bf16[128,64], index: 3, kind: input, shape index: {}]   ;;  %s1244_s0 = inlined_call_operand.vmem [shape: f32[4,48], index: 0, kind: input, shape index: {}]   ;;  %s1245_s4 = inlined_call_operand.vmem [shape: bf16[116,256], index: 4, kind: input, shape index: {}]   ;;  %s1246_s8 = inlined_call_operand.vmem [shape: f32[8,256], index: 8, kind: input, shape index: {}]   ;;  %s1247_s1 = inlined_call_operand.vmem [shape: f32[4,4], index: 1, kind: input, shape index: {}]   ;;  %s1248_s5 = inlined_call_operand.vmem [shape: bf16[256,128], index: 5, kind: input, shape index: {}]   ;;  %s1249_s6 = inlined_call_operand.vmem [shape: bf16[128,64], index: 6, kind: input, shape index: {}]   ;;  %s1250_s7 = inlined_call_operand.vmem [shape: f32[1,64], index: 7, kind: input, shape index: {}]   ;;  %s1251_s9 = inlined_call_operand.vmem [shape: f32[4,1], index: 9, kind: output, shape index: {}]  }
   0x1   :  { %863 = vmatprep.subr.bf16.mxu0 %v974_v0  ;;  %v916_v1 = vld [vmem:[%s1242_s2 + $0x10] sm:$0xff]   ;;  %869 = vmatprep.mubr.msk.bf16.mxu0 %vm975_vm0, %v974_v0  ;;  %v917_v2 = vld [vmem:[%s1242_s2 + $0x8] sm:$0xff]   ;;  %v918_v3 = vld [vmem:[%s1242_s2] sm:$0xff]   ;;  %vm395_vm2 = vcmask 1041408   ;;  %vm391_vm3 = vcmask 31744   ;;  %vm339_vm4 = vcmask 523264  }
   0x2   :  { %873 = vmatprep.subr.bf16.mxu1 %v974_v0  ;;  %889 = vmatprep.mubr.msk.bf16.mxu1 %vm975_vm0, %v974_v0  ;;  %v919_v4 = vld [vmem:[%s1243_s3 + $0x38] sm:$0xff]   ;;  %v33_v5 = vld [vmem:[%s1244_s0] sm:$0xf]  ;;  %v920_v6 = vld [vmem:[%s1243_s3 + $0x30] sm:$0xff]   ;;  %vm749_vm5 = vcmask 519168   ;;  %vm755_vm6 = vcmask 3072  }
   0x3   :  { %864 = vmatpush3.bf16.msra.mxu0 %v916_v1  ;;  %874 = vmatpush3.bf16.msra.mxu1 %v919_v4  ;;  %v35_v7 = vpack.c.bf16 %v33_v5, %v33_v5  ;;  %v921_v8 = vld [vmem:[%s1243_s3 + $0x28] sm:$0xff]   ;;  %v922_v9 = vld [vmem:[%s1243_s3 + $0x20] sm:$0xff]   ;;  %v923_v10 = vld [vmem:[%s1243_s3 + $0x18] sm:$0xff]  }
   0x4   :  { %865 = vmatprep.subr.bf16.mxu0 %v974_v0  ;;  %875 = vmatprep.subr.bf16.mxu1 %v974_v0  ;;  %v924_v11 = vld [vmem:[%s1243_s3 + $0x10] sm:$0xff]   ;;  %v925_v12 = vld [vmem:[%s1243_s3 + $0x8] sm:$0xff]   ;;  %v926_v13 = vld [vmem:[%s1243_s3] sm:$0xff]  }
   0x5   :  { %v927_v14 = vld [vmem:[%s1245_s4 + $0x60] ss:$8 sps:$4 sm:$0xff]   ;;  %v929_v16 = vld [vmem:[%s1245_s4 + $0x64] ss:$8 sps:$4 sm:$0xff]   ;;  %v932_v17 = vld [vmem:[%s1245_s4 + $0x54] ss:$8 sps:$4 sm:$0xff]  }
   0x6   :  { %v930_v18 = vld [vmem:[%s1245_s4 + $0x50] ss:$8 sps:$4 sm:$0xff]   ;;  %v935_v19 = vld [vmem:[%s1245_s4 + $0x44] ss:$8 sps:$4 sm:$0xff]   ;;  %v933_v20 = vld [vmem:[%s1245_s4 + $0x40] ss:$8 sps:$4 sm:$0xff]  }
   0x7   :  { %866 = vmatpush3.bf16.msra.mxu0 %v917_v2  ;;  %876 = vmatpush3.bf16.msra.mxu1 %v920_v6  ;;  %v385_v21 = vld [vmem:[%s1245_s4 + $0x70] sm:$0x33]  ;;  %v941_v25 = vld [vmem:[%s1245_s4 + $0x24] ss:$8 sps:$4 sm:$0xff]   ;;  %v939_v26 = vld [vmem:[%s1245_s4 + $0x20] ss:$8 sps:$4 sm:$0xff]  }
   0x8   :  { %867 = vmatprep.subr.bf16.mxu0 %v974_v0  ;;  %877 = vmatprep.subr.bf16.mxu1 %v974_v0  ;;  %v938_v22 = vld [vmem:[%s1245_s4 + $0x34] ss:$8 sps:$4 sm:$0xff]   ;;  %v790_v23 = vcombine.high %v385_v21, %v385_v21  ;;  %v936_v24 = vld [vmem:[%s1245_s4 + $0x30] ss:$8 sps:$4 sm:$0xff]   ;;  %v42_v29 = vld [vmem:[%s1246_s8] ss:$0 sm:$0xff]  ;;  %v789_v37 = vcombine.low %v385_v21, %v385_v21 }
   0x9   :  { %v944_v27 = vld [vmem:[%s1245_s4 + $0x14] ss:$8 sps:$4 sm:$0xff]   ;;  %v942_v28 = vld [vmem:[%s1245_s4 + $0x10] ss:$8 sps:$4 sm:$0xff]   ;;  %v34_v39 = vld [vmem:[%s1247_s1] sm:$0xf] }
   0xa   :  { %v397_v38 = vsel %vm395_vm2, %v789_v37, 0  ;;  %v949_v40 = vld [vmem:[%s1245_s4 + $0x4] ss:$8 sps:$4 sm:$0xff]   ;;  %v384_v41 = vpack.c.bf16 %v34_v39, %v34_v39  ;;  %v947_v42 = vld [vmem:[%s1245_s4] ss:$8 sps:$4 sm:$0xff]   ;;  %v950_v43 = vld [vmem:[%s1248_s5 + $0x78] sm:$0xff]  }
   0xb   :  { %868 = vmatpush3.bf16.msra.mxu0 %v918_v3  ;;  %878 = vmatpush3.bf16.msra.mxu1 %v921_v8  ;;  %v123_v48 = vld [vmem:[%s1246_s8 + $0x1] ss:$0 sm:$0xff]  ;;  %v951_v54 = vld [vmem:[%s1248_s5 + $0x38] sm:$0xff]   ;;  %v952_v56 = vld [vmem:[%s1248_s5 + $0x70] sm:$0xff]  }
   0xc   :  { %879 = vmatprep.subr.bf16.mxu1 %v974_v0  ;;  %268 = vmatprep.subr.bf16.mxu0 %v929_v16  ;;  %v953_v58 = vld [vmem:[%s1248_s5 + $0x30] sm:$0xff]   ;;  %v954_v59 = vld [vmem:[%s1248_s5 + $0x68] sm:$0xff]   ;;  %v956_v61 = vld [vmem:[%s1248_s5 + $0x60] sm:$0xff]  }
   0xd   :  { %v955_v60 = vld [vmem:[%s1248_s5 + $0x28] sm:$0xff]   ;;  %v957_v62 = vld [vmem:[%s1248_s5 + $0x20] sm:$0xff]   ;;  %v958_v63 = vld [vmem:[%s1248_s5 + $0x58] sm:$0xff]  }
   0xe   :  { %870 = vmatmul.mubr.msk.bf16.vlgmr.msra.gmra.mxu0 %vm61_vm1, %v35_v7  ;;  %v959_v1 = vld [vmem:[%s1248_s5 + $0x18] sm:$0xff]   ;;  %v960_v5 = vld [vmem:[%s1248_s5 + $0x50] sm:$0xff]   ;;  %v962_v8 = vld [vmem:[%s1248_s5 + $0x48] sm:$0xff]  }
   0xf   :  { %880 = vmatpush3.bf16.msra.mxu1 %v922_v9  ;;  %290 = vmatprep.mubr.bf16.mxu0 %v976_v15  ;;  %v961_v6 = vld [vmem:[%s1248_s5 + $0x10] sm:$0xff]   ;;  %v963_v9 = vld [vmem:[%s1248_s5 + $0x8] sm:$0xff]   ;;  %v970_v16 = vld [vmem:[%s1249_s6 + $0x18] sm:$0xff]  }
  0x10   :  { %881 = vmatprep.subr.bf16.mxu1 %v974_v0  ;;  %269 = vmatpush1.bf16.msra.mxu0 %v927_v14  ;;  %v968_v14 = vld [vmem:[%s1249_s6 + $0x28] sm:$0xff]  }
  0x11   :  { %270 = vmatprep.subr.bf16.mxu0 %v932_v17  ;;  %v448_v17 = vlaneseq  ;;  %v972_v39 = vld [vmem:[%s1249_s6 + $0x8] sm:$0xff]  }
  0x13   :  { %882 = vmatpush3.bf16.msra.mxu1 %v923_v10  ;;  %v964_v10 = vld [vmem:[%s1248_s5 + $0x40] sm:$0xff]  }
  0x14   :  { %883 = vmatprep.subr.bf16.mxu1 %v974_v0  ;;  %271 = vmatpush1.bf16.msra.mxu0 %v930_v18  ;;  %v449_v18 = vshrl.u32 %v448_v17, 7 }
  0x15   :  { %272 = vmatprep.subr.bf16.mxu0 %v935_v19 }
  0x16   :  { %v450_v19 = vsub.s32 0, %v449_v18  ;;  %v454_v21 = vsub.s32 1, %v449_v18 }
  0x17   :  { %884 = vmatpush3.bf16.msra.mxu1 %v924_v11  ;;  %v965_v11 = vld [vmem:[%s1248_s5] sm:$0xff]  }
  0x18   :  { %885 = vmatprep.subr.bf16.mxu1 %v974_v0  ;;  %273 = vmatpush1.bf16.msra.mxu0 %v933_v20  ;;  %v793_v20 = vld [vmem:[%s1246_s8 + $0x2] ss:$8 sm:$0x3] }
  0x19   :  { %351 = vmatprep.subr.bf16.mxu0 %v938_v22 }
  0x1b   :  { %886 = vmatpush3.bf16.msra.mxu1 %v925_v12  ;;  %779 = vmatmul.mubr.msk.bf16.vlgmr.msra.gmra.mxu0 %vm61_vm1, %v35_v7  ;;  %v966_v12 = vld [vmem:[%s1249_s6 + $0x38] sm:$0xff]  }
  0x1c   :  { %887 = vmatprep.subr.bf16.mxu1 %v974_v0  ;;  %352 = vmatpush1.bf16.msra.mxu0 %v936_v24  ;;  %v451_v24 = vrot.slane %v793_v20, %v450_v19 }
  0x1d   :  { %375 = vmatprep.mubr.bf16.mxu0 %v976_v15  ;;  %353 = vmatprep.subr.bf16.mxu0 %v941_v25 }
  0x1f   :  { %888 = vmatpush3.bf16.msra.mxu1 %v926_v13  ;;  %v967_v13 = vld [vmem:[%s1249_s6 + $0x30] sm:$0xff]  }
  0x20   :  { %791 = vmatprep.subr.msk.bf16.mxu1 %vm395_vm2, %v790_v23  ;;  %354 = vmatpush1.bf16.msra.mxu0 %v939_v26 }
  0x21   :  { %355 = vmatprep.subr.bf16.mxu0 %v944_v27 }
  0x24   :  { %356 = vmatpush1.bf16.msra.mxu0 %v942_v28  ;;  %v455_v28 = vrot.slane %v793_v20, %v454_v21 }
  0x25   :  { %357 = vmatprep.subr.bf16.mxu0 %v949_v40  ;;  %v973_v40 = vld [vmem:[%s1249_s6] sm:$0xff]  }
  0x28   :  { %358 = vmatpush1.bf16.msra.mxu0 %v947_v42  ;;  %v496_v42 = vld [vmem:[%s1246_s8 + $0x3] ss:$0 sm:$0xff] }
  0x29   :  { %832 = vmatprep.subr.bf16.mxu0 %v950_v43 }
  0xce   :  { %v99_v30 = vpop.f32.mrf.mxu0 }
  0xcf   :  { %v100_v31 = vadd.f32 %v99_v30, %v42_v29 }
  0xd0   :  { %v871_v32 = vpop.f32.mrf.mxu0 }
  0xd1   :  { %v105_v33 = vmax.f32 %v100_v31, 0.0 }
  0xd2   :  { %v102_v34 = vpop.f32.mrf.mxu0 }
  0xd3   :  { %v106_v35 = vpack.c.bf16 %v105_v33, %v105_v33 }
  0xd4   :  { %v872_v36 = vpop.f32.mrf.mxu0 }
  0xd5   :  { %890 = vmatmul.mubr.bf16.vlgmr.msra.gmra.mxu1 %v106_v35 }
  0xd6   :  { %434 = vmatprep.mubr.bf16.mxu1 %v976_v15  ;;  %417 = vmatpush1.bf16.msra.mxu1 %v397_v38  ;;  %v969_v15 = vld [vmem:[%s1249_s6 + $0x20] sm:$0xff]   ;;  %v971_v38 = vld [vmem:[%s1249_s6 + $0x10] sm:$0xff]  }
  0xd7   :  { %893 = vmatprep.subr.bf16.mxu1 %v974_v0 }
  0xdb   :  { %v1139_v44 = vpop.f32.mrf.mxu0 }
  0xdd   :  { %792 = vmatmul.mubr.msk.bf16.vlgmr.msra.gmra.mxu1 %vm391_vm3, %v384_v41  ;;  %v1141_v45 = vpop.f32.mrf.mxu0 }
  0xde   :  { %909 = vmatprep.mubr.msk.bf16.mxu1 %vm975_vm0, %v974_v0  ;;  %894 = vmatpush3.bf16.msra.mxu1 %v966_v12 }
  0xdf   :  { %v296_v46 = vpop.f32.mrf.mxu0  ;;  %895 = vmatprep.subr.bf16.mxu1 %v974_v0 }
  0xe1   :  { %v297_v47 = vpop.f32.mrf.mxu0 }
  0xe2   :  { %896 = vmatpush3.bf16.msra.mxu1 %v967_v13 }
  0xe3   :  { %897 = vmatprep.subr.bf16.mxu1 %v974_v0 }
  0xe6   :  { %898 = vmatpush3.bf16.msra.mxu1 %v968_v14 }
  0xe7   :  { %899 = vmatprep.subr.bf16.mxu1 %v974_v0 }
  0xea   :  { %900 = vmatpush3.bf16.msra.mxu1 %v969_v15 }
  0xeb   :  { %901 = vmatprep.subr.bf16.mxu1 %v974_v0 }
  0xee   :  { %902 = vmatpush3.bf16.msra.mxu1 %v970_v16 }
  0xef   :  { %903 = vmatprep.subr.bf16.mxu1 %v974_v0 }
  0xf2   :  { %904 = vmatpush3.bf16.msra.mxu1 %v971_v38 }
  0xf3   :  { %905 = vmatprep.subr.bf16.mxu1 %v974_v0 }
  0xf6   :  { %906 = vmatpush3.bf16.msra.mxu1 %v972_v39 }
  0xf7   :  { %907 = vmatprep.subr.bf16.mxu1 %v974_v0  ;;  %v651_v0 = vld [vmem:[%s1246_s8 + $0x4] ss:$0 sm:$0xff] }
  0xfa   :  { %908 = vmatpush3.bf16.msra.mxu1 %v973_v40 }
 0x195   :  { %v206_v49 = vpop.f32.mrf.mxu1 }
 0x196   :  { %v207_v50 = vadd.f32 %v206_v49, %v123_v48 }
 0x197   :  { %v891_v51 = vpop.f32.mrf.mxu1 }
 0x198   :  { %v212_v52 = vmax.f32 %v207_v50, 0.0 }
 0x199   :  { %v209_v53 = vpop.f32.mrf.mxu1 }
 0x19a   :  { %v213_v55 = vpack.c.bf16 %v212_v52, %v212_v52  ;;  %v818_v53 = vld [vmem:[%s1250_s7] ss:$0 sm:$0xff] }
 0x19b   :  { %v892_v57 = vpop.f32.mrf.mxu1 }
 0x19c   :  { %788 = vmatmul.mubr.msk.bf16.vlgmr.msra.gmra.mxu0 %vm339_vm4, %v213_v55 }
 0x19d   :  { %833 = vmatpush3.bf16.msra.mxu0 %v951_v54  ;;  %v436_v2 = vpop.f32.mrf.mxu1 }
 0x19e   :  { %834 = vmatprep.subr.bf16.mxu0 %v952_v56 }
 0x19f   :  { %v438_v3 = vpop.f32.mrf.mxu1 }
 0x1a1   :  { %835 = vmatpush3.bf16.msra.mxu0 %v953_v58  ;;  %v440_v4 = vpop.f32.mrf.mxu1 }
 0x1a2   :  { %836 = vmatprep.subr.bf16.mxu0 %v954_v59  ;;  %v753_v59 = vld [vmem:[%s1246_s8 + $0x5] ss:$0 sm:$0xff] }
 0x1a3   :  { %v441_v7 = vpop.f32.mrf.mxu1 }
 0x1a5   :  { %837 = vmatpush3.bf16.msra.mxu0 %v955_v60 }
 0x1a6   :  { %838 = vmatprep.subr.bf16.mxu0 %v956_v61 }
 0x1a9   :  { %839 = vmatpush3.bf16.msra.mxu0 %v957_v62 }
 0x1aa   :  { %840 = vmatprep.subr.bf16.mxu0 %v958_v63 }
 0x1ad   :  { %841 = vmatpush3.bf16.msra.mxu0 %v959_v1 }
 0x1ae   :  { %842 = vmatprep.subr.bf16.mxu0 %v960_v5 }
 0x1b1   :  { %843 = vmatpush3.bf16.msra.mxu0 %v961_v6 }
 0x1b2   :  { %844 = vmatprep.subr.bf16.mxu0 %v962_v8 }
 0x1b5   :  { %845 = vmatpush3.bf16.msra.mxu0 %v963_v9 }
 0x1b6   :  { %846 = vmatprep.subr.bf16.mxu0 %v964_v10 }
 0x1b9   :  { %847 = vmatpush3.bf16.msra.mxu0 %v965_v11 }
 0x25c   :  { %v377_v22 = vpop.f32.mrf.mxu0 }
 0x25d   :  { %v378_v23 = vadd.f32 %v377_v22, %v1139_v44 }
 0x25e   :  { %v379_v25 = vpop.f32.mrf.mxu0 }
 0x25f   :  { %v443_v26 = vadd.f32 %v436_v2, %v378_v23  ;;  %v380_v27 = vadd.f32 %v379_v25, %v1141_v45 }
 0x260   :  { %v381_v29 = vpop.f32.mrf.mxu0 }
 0x261   :  { %v458_v30 = vadd.f32 %v451_v24, %v443_v26  ;;  %v444_v31 = vadd.f32 %v438_v3, %v380_v27 }
 0x262   :  { %v382_v32 = vpop.f32.mrf.mxu0 }
 0x263   :  { %v459_v33 = vadd.f32 %v455_v28, %v444_v31  ;;  %v460_v34 = vmax.f32 %v458_v30, 0.0 }
 0x265   :  { %v461_v35 = vmax.f32 %v459_v33, 0.0  ;;  %v462_v37 = vpack.c.bf16 %v460_v34, %v460_v34 }
 0x267   :  { %v463_v36 = vpack.c.bf16 %v461_v35, %v461_v35 }
 0x269   :  { %625 = vmatprep.mubr.bf16.mxu0 %v463_v36 }
 0x26a   :  { %626 = vmatmul.mubr.bf16.vlgmr.msra.gmra.mxu0 %v462_v37 }
 0x32a   :  { %v848_v41 = vpop.f32.mrf.mxu0 }
 0x32c   :  { %v849_v43 = vpop.f32.mrf.mxu0 }
 0x32d   :  { %v850_v44 = vadd.f32 %v849_v43, %v848_v41 }
 0x32e   :  { %v851_v45 = vpop.f32.mrf.mxu0 }
 0x32f   :  { %v628_v46 = vadd.f32 %v850_v44, %v496_v42 }
 0x330   :  { %v852_v47 = vpop.f32.mrf.mxu0 }
 0x331   :  { %v633_v48 = vmax.f32 %v628_v46, 0.0 }
 0x333   :  { %v634_v49 = vpack.c.bf16 %v633_v48, %v633_v48 }
 0x335   :  { %910 = vmatmul.mubr.bf16.vlgmr.msra.gmra.mxu1 %v634_v49 }
 0x3f5   :  { %v734_v50 = vpop.f32.mrf.mxu1 }
 0x3f6   :  { %v735_v51 = vadd.f32 %v734_v50, %v651_v0 }
 0x3f7   :  { %v911_v52 = vpop.f32.mrf.mxu1 }
 0x3f8   :  { %v740_v54 = vmax.f32 %v735_v51, 0.0 }
 0x3f9   :  { %v737_v55 = vpop.f32.mrf.mxu1 }
 0x3fa   :  { %v748_v56 = vmul.f32 %v818_v53, %v740_v54 }
 0x3fb   :  { %v912_v57 = vpop.f32.mrf.mxu1 }
 0x3fc   :  { %v750_v58 = vsel %vm749_vm5, %v748_v56, 0.0 }
 0x3fd   :  { %751 = vadd.xlane.f32.xlu0 %v750_v58 }
 0x486   :  { %v752_v60 = vpop.xlane.xlu0 %751 }
 0x487   :  { %v754_v61 = vadd.f32 %v753_v59, %v752_v60 }
 0x489   :  { %756 = vst.msk [vmem:[%s1251_s9] sm:$0xf] %vm755_vm6, %v754_v61 }

</bundles_post_ra>
